<compile_context>
chip_gen: v7x
topology: tpu7x:2x2x1
jax: 0.10.0
libtpu: 0.0.40
codegen_flags: <defaults>
</compile_context>

<pallas_src>
import itertools

import jax
import jax.numpy as jnp
from jax.experimental import pallas as pl
from jax.experimental.pallas import tpu as pltpu


def _round_up(x, m):
    return ((x + m - 1) // m) * m


# ----------------------------------------------------------------------------
# Parameter / buffer construction (plain JAX — mirrors TPSGridGen.__init__)
# ----------------------------------------------------------------------------
def compute_partial_repr(input_points, control_points):
    """TPS radial basis: 0.5 * r^2 * log(r^2), with NaN (r=0) -> 0."""
    N = input_points.shape[0]
    M = control_points.shape[0]
    diff = input_points.reshape(N, 1, 2) - control_points.reshape(1, M, 2)
    dist = jnp.sum(diff * diff, axis=-1)                        # [N, M]
    repr_matrix = 0.5 * dist * jnp.log(dist)
    return jnp.where(jnp.isnan(repr_matrix), 0.0, repr_matrix)


def build_tps_buffers(target_height, target_width, target_control_points,
                      max_hw_tile=4096):
    """Builds all constants, including the fused/padded kernel operand."""
    cp = target_control_points.astype(jnp.float32)              # [N, 2]
    N = cp.shape[0]

    # forward_kernel and its inverse
    fk = jnp.zeros((N + 3, N + 3), dtype=jnp.float32)
    fk = fk.at[:N, :N].set(compute_partial_repr(cp, cp))
    fk = fk.at[:N, N].set(1.0)           # column -3
    fk = fk.at[N, :N].set(1.0)           # row    -3
    fk = fk.at[:N, N + 1:].set(cp)       # columns -2:
    fk = fk.at[N + 1:, :N].set(cp.T)     # rows    -2:
    inverse_kernel = jnp.linalg.inv(fk)                          # [N+3, N+3]

    # target coordinate grid in [-1, 1], ordered (X, Y) like the PyTorch code
    HW = target_height * target_width
    yx = jnp.asarray(
        list(itertools.product(range(target_height), range(target_width))),
        dtype=jnp.float32)                                       # [HW, 2] = (Y, X)
    Y = yx[:, 0:1] * 2.0 / (target_height - 1) - 1.0
    X = yx[:, 1:2] * 2.0 / (target_width - 1) - 1.0
    target_coordinate = jnp.concatenate([X, Y], axis=1)          # [HW, 2]

    tc_partial = compute_partial_repr(target_coordinate, cp)     # [HW, N]
    target_coordinate_repr = jnp.concatenate(
        [tc_partial, jnp.ones((HW, 1), jnp.float32), target_coordinate],
        axis=1)                                                  # [HW, N+3]

    # Fusion: (rep @ inv), keep only the first N columns (the 3 padding rows
    # of Y are zero), pad the contraction dim to a multiple of 8, pad HW to a
    # multiple of the lane tile, and transpose so HW is the lane (last) dim.
    combined = (target_coordinate_repr @ inverse_kernel)[:, :N]  # [HW, N]
    n_pad = _round_up(N, 8)
    hw128 = _round_up(HW, 128)
    hw_tile = hw128 if hw128 <= max_hw_tile else max_hw_tile
    hw_pad = _round_up(HW, hw_tile)
    combined_t = jnp.pad(
        combined, ((0, hw_pad - HW), (0, n_pad - N))).T          # [n_pad, hw_pad]

    return dict(
        inverse_kernel=inverse_kernel,
        target_coordinate_repr=target_coordinate_repr,
        combined_t=combined_t,
        num_points=N,
        n_pad=n_pad,
        hw=HW,
        hw_pad=hw_pad,
        hw_tile=hw_tile,
    )


# ----------------------------------------------------------------------------
# Pallas kernel: out_T[B*2, hw_tile] = src_T[B*2, N_pad] @ combined_T tile
# ----------------------------------------------------------------------------
def tps_forward_kernel(src_ref, comb_ref, out_ref):
    # src_ref : [B*2, N_pad]        (same block every grid step)
    # comb_ref: [N_pad, HW_TILE]    (streamed, double-buffered, per HW tile)
    # out_ref : [B*2, HW_TILE]      (lane-dense full-width store)
    out_ref[...] = jnp.dot(src_ref[...], comb_ref[...],
                           preferred_element_type=jnp.float32)


def tps_grid_gen_forward(buffers, source_control_points):
    """source_control_points: [B, N, 2] -> source_coordinate: [B, HW, 2]."""
    B, N, two = source_control_points.shape
    assert two == 2 and N == buffers["num_points"]
    n_pad = buffers["n_pad"]
    hw = buffers["hw"]
    hw_pad = buffers["hw_pad"]
    hw_tile = buffers["hw_tile"]
    combined_t = buffers["combined_t"]
    b2 = B * 2

    # [B, N, 2] -> [B*2, N] (x/y as rows) -> pad contraction dim to n_pad.
    src_t = jnp.transpose(source_control_points.astype(jnp.float32),
                          (0, 2, 1)).reshape(b2, N)
    src_t = jnp.pad(src_t, ((0, 0), (0, n_pad - N)))

    out_t = pl.pallas_call(
        tps_forward_kernel,
        out_shape=jax.ShapeDtypeStruct((b2, hw_pad), jnp.float32),
        grid_spec=pltpu.PrefetchScalarGridSpec(
            num_scalar_prefetch=0,
            grid=(hw_pad // hw_tile,),
            in_specs=[
                pl.BlockSpec((b2, n_pad), lambda h: (0, 0)),      # src (tiny)
                pl.BlockSpec((n_pad, hw_tile), lambda h: (0, h)),  # combined^T
            ],
            out_specs=pl.BlockSpec((b2, hw_tile), lambda h: (0, h)),
        ),
        compiler_params=pltpu.CompilerParams(
            dimension_semantics=("parallel",),
        ),
    )(src_t, combined_t)

    # [B*2, HW_pad] -> [B, HW, 2]  (pure layout plumbing in the wrapper)
    return jnp.transpose(out_t[:, :hw].reshape(B, 2, hw), (0, 2, 1))


# ----------------------------------------------------------------------------
# Pure-JAX reference (mirrors PyTorch forward, unfused) for a sanity check
# ----------------------------------------------------------------------------
def tps_forward_ref(inverse_kernel, target_coordinate_repr, source_control_points):
    B = source_control_points.shape[0]
    y = jnp.concatenate(
        [source_control_points.astype(jnp.float32),
         jnp.zeros((B, 3, 2), jnp.float32)], axis=1)
    mapping = jnp.einsum("ij,bjk->bik", inverse_kernel, y)
    return jnp.einsum("hj,bjk->bhk", target_coordinate_repr, mapping)


if __name__ == "__main__":
    # Small deterministic configuration: 4x4 = 16 control points on a regular
    # grid in [-1, 1], target grid 16x16  ->  N=16, HW=256.
    target_height, target_width = 16, 16
    r = jnp.linspace(-1.0, 1.0, 4)
    gy, gx = jnp.meshgrid(r, r, indexing="ij")
    target_control_points = jnp.stack(
        [gx.reshape(-1), gy.reshape(-1)], axis=1).astype(jnp.float32)  # [16, 2]

    # Source control points: target grid + small deterministic perturbation.
    key = jax.random.PRNGKey(0)
    batch_size = 2
    N = target_control_points.shape[0]
    noise = 0.1 * jax.random.normal(key, (batch_size, N, 2), dtype=jnp.float32)
    source_control_points = target_control_points[None, :, :] + noise

    # --- single HW tile (HW=256 fits one lane-dense block) ------------------
    bufs = build_tps_buffers(target_height, target_width, target_control_points)
    out = tps_grid_gen_forward(bufs, source_control_points)
    out = jax.block_until_ready(out)

    ref = tps_forward_ref(bufs["inverse_kernel"], bufs["target_coordinate_repr"],
                          source_control_points)
    assert out.shape == (batch_size, target_height * target_width, 2)
    assert jnp.allclose(out, ref, atol=5e-4, rtol=5e-4)

    # --- multi-tile path (force hw_tile=128 -> grid of 2 parallel steps) ----
    bufs_tiled = build_tps_buffers(target_height, target_width,
                                   target_control_points, max_hw_tile=128)
    out_tiled = jax.block_until_ready(
        tps_grid_gen_forward(bufs_tiled, source_control_points))
    assert jnp.allclose(out_tiled, ref, atol=5e-4, rtol=5e-4)

    print("KERNEL_OK")
</pallas_src>

<mosaic_0001>
module attributes {stable_mosaic.version = 11 : i64} {
  func.func @tps_forward_kernel(%arg0: i32, %arg1: memref<4x16xf32, #tpu.memory_space<vmem>>, %arg2: memref<16x256xf32, #tpu.memory_space<vmem>>, %arg3: memref<4x256xf32, #tpu.memory_space<vmem>>) attributes {dimension_semantics = [#tpu.dimension_semantics<parallel>], iteration_bounds = array<i64: 1>, scalar_prefetch = 0 : i64, scratch_operands = 0 : i64, tpu.core_type = #tpu.core_type<tc>, window_params = [{pipeline_mode = #tpu.pipeline_mode<synchronous>, transform_indices = @transform_0, window_bounds = array<i64: 4, 16>}, {transform_indices = @transform_1, window_bounds = array<i64: 16, 256>}, {transform_indices = @transform_2, window_bounds = array<i64: 4, 256>}]} {
    %c0 = arith.constant 0 : index
    %c0_0 = arith.constant 0 : index
    %0 = vector.load %arg1[%c0, %c0_0] : memref<4x16xf32, #tpu.memory_space<vmem>>, vector<4x16xf32>
    %c0_1 = arith.constant 0 : index
    %c0_2 = arith.constant 0 : index
    %1 = vector.load %arg2[%c0_1, %c0_2] : memref<16x256xf32, #tpu.memory_space<vmem>>, vector<16x256xf32>
    %cst = arith.constant dense<0.000000e+00> : vector<4x256xf32>
    %2 = tpu.matmul %0, %1, %cst {dimension_numbers = #tpu.dot_dimension_numbers<[1], [0], [0], [1], [0, 0, 1, 1], [], []>} : vector<4x16xf32>, vector<16x256xf32>, vector<4x256xf32> -> vector<4x256xf32>
    %c0_3 = arith.constant 0 : index
    %c0_4 = arith.constant 0 : index
    %3 = vector.load %arg3[%c0_3, %c0_4] : memref<4x256xf32, #tpu.memory_space<vmem>>, vector<4x256xf32>
    tpu.vector_store %arg3[%c0_3, %c0_4], %2 {strides = array<i32>} : memref<4x256xf32, #tpu.memory_space<vmem>>, vector<4x256xf32>,
    return
  }
  func.func @transform_0(%arg0: i32) -> (i32, i32) {
    %c0_i32 = arith.constant 0 : i32
    %c0_i32_0 = arith.constant 0 : i32
    %c0_i32_1 = arith.constant 0 : i32
    return %c0_i32, %c0_i32_0 : i32, i32
  }
  func.func @transform_1(%arg0: i32) -> (i32, i32) {
    %c0_i32 = arith.constant 0 : i32
    %c0_i32_0 = arith.constant 0 : i32
    return %c0_i32, %arg0 : i32, i32
  }
  func.func @transform_2(%arg0: i32) -> (i32, i32) {
    %c0_i32 = arith.constant 0 : i32
    %c0_i32_0 = arith.constant 0 : i32
    return %c0_i32, %arg0 : i32, i32
  }
}

</mosaic_0001>

<bundles_post_ra>
// kernel: tpu_custom_call.1
= control target key start
LH: loop header
LB: loop body
LE: loop exit
PB: predicated region body
PF: predicated region fallthrough
CT: control target
= control target key end

     0   :  { %7 = vsyncpa [#allocation3], 0  ;;  %s286_s0 = inlined_call_operand.hbm [shape: f32[4,16], index: 0, kind: input, shape index: {}]   ;;  %s287_s1 = inlined_call_operand.hbm [shape: f32[16,256], index: 1, kind: input, shape index: {}]   ;;  %s288_s2 = inlined_call_operand.hbm [shape: f32[4,256], index: 2, kind: output, shape index: {}]  }
   0x1   :  { %8 = vsyncpa [#allocation6], 0 }
   0x2   :  { %9 = vsyncpa [#allocation4], 0  ;;  %s222_s9 = smov [#allocation2]   ;;  %s223_s11 = smov [#allocation5]  }
   0x3   :  { %s16_s10 = sshll.u32 %s222_s9, 4  ;;  %s25_s12 = sshll.u32 %s223_s11, 4  ;;  %s17_s10 = int_to_ptr.vmem [resolvable:$true] %s16_s10  ;;  %s243_s12 = int_to_ptr.vmem [resolvable:$true] %s25_s12 }
   0x4   :  { %s150_s15 = scalar_lea.hbm %s286_s0, 64 }
   0x5   :  { %p151_p0 = scmp.ne.s32.totalorder %s286_s0, %s150_s15  ;;  %p154_p1 = scmp.lt.u32.totalorder %s150_s15, %s286_s0 }
   0x7   :  { %p156_p2 = pnand %p154_p1, %p151_p0 }
   0x9   :  { %159 = shalt.err (!%p156_p2)
}
   0xa   :  { %s160_s20 = scalar_lea.vmem %s17_s10, 64  ;;  %p165_p4 = scmp.lt.s32.totalorder %s17_s10, %s17_s10 }
   0xb   :  { %p161_p3 = scmp.ne.s32.totalorder %s17_s10, %s160_s20  ;;  %p166_p5 = scmp.lt.s32.totalorder %s160_s20, %s160_s20 }
   0xd   :  { %p167_p6 = por %p166_p5, %p165_p4 }
   0xf   :  { %p168_p7 = pnand %p167_p6, %p161_p3 }
  0x11   :  { %171 = shalt.err (!%p168_p7)
}
  0x12   :  { %19 = dma.hbm_to_vmem [thread:$0]  %s286_s0, 64, %s17_s10, [#allocation3]  }
  0x13   :  { %s172_s25 = scalar_lea.hbm %s287_s1, 512 }
  0x14   :  { %p173_p8 = scmp.ne.s32.totalorder %s287_s1, %s172_s25  ;;  %p176_p9 = scmp.lt.u32.totalorder %s172_s25, %s287_s1 }
  0x16   :  { %p178_p10 = pnand %p176_p9, %p173_p8 }
  0x18   :  { %181 = shalt.err (!%p178_p10)
}
  0x19   :  { %s182_s30 = scalar_lea.vmem %s243_s12, 512  ;;  %p187_p12 = scmp.lt.s32.totalorder %s243_s12, %s243_s12 }
  0x1a   :  { %p183_p11 = scmp.ne.s32.totalorder %s243_s12, %s182_s30  ;;  %p188_p13 = scmp.lt.s32.totalorder %s182_s30, %s182_s30 }
  0x1c   :  { %p189_p0 = por %p188_p13, %p187_p12 }
  0x1e   :  { %p190_p1 = pnand %p189_p0, %p183_p11 }
  0x20   :  { %193 = shalt.err (!%p190_p1)
}
  0x21   :  { %s224_s0 = smov 256   ;;  %s225_s3 = smov 16  }
  0x22   :  { %31 = dma.hbm_to_vmem [thread:$0]  %s287_s1, 512, %s243_s12, [#allocation6], %s224_s0, %s224_s0, %s225_s3  }
  0x23   :  { %216 = dma.done.wait [#allocation3], 64  }
  0x24   :  { %217 = vsyncadd [#allocation3], 4294967232 }
  0x25   :  { %218 = dma.done.wait [#allocation6], 512  }
  0x26   :  { %219 = vsyncadd [#allocation6], 4294966784  ;;  %v226_v0 = vmov 0.0   ;;  %v40_v1 = vld [vmem:[#allocation5 + $0x8] sm:$0xff]  ;;  %v42_v2 = vld [vmem:[#allocation5 + $0x18] sm:$0xff]  ;;  %vm43_vm0 = vcmask 130048  }
  0x27   :  { %111 = vmatprep.mubr.f32.mxu0 %v226_v0  ;;  %v39_v3 = vld [vmem:[#allocation5] sm:$0xff]  ;;  %v140_v4 = vpack.c.bf16 %v42_v2, %v40_v1  ;;  %v41_v5 = vld [vmem:[#allocation5 + $0x10] sm:$0xff]  ;;  %v38_v7 = vld [vmem:[#allocation2] sm:$0xf]  ;;  %s227_s6 = smov [#allocation7]  }
  0x28   :  { %v142_v6 = vpack.c.bf16 %v41_v5, %v39_v3  ;;  %s129_s7 = sshll.u32 %s227_s6, 4  ;;  %s130_s7 = int_to_ptr.vmem [resolvable:$true] %s129_s7 }
  0x29   :  { %141 = vmatprep.subr.bf16.mxu0 %v140_v4  ;;  %s194_s1 = scalar_lea.vmem %s130_s7, 128  ;;  %p199_p3 = scmp.lt.s32.totalorder %s130_s7, %s130_s7 }
  0x2a   :  { %143 = vmatpush1.bf16.msra.mxu0 %v142_v6  ;;  %p195_p2 = scmp.ne.s32.totalorder %s130_s7, %s194_s1  ;;  %p200_p4 = scmp.lt.s32.totalorder %s194_s1, %s194_s1 }
  0x2c   :  { %p201_p5 = por %p200_p4, %p199_p3 }
  0x2d   :  { %139 = vmatmul.mubr.msk.f32.vlgmr.msra.gmra.mrb[0].mxu0 %vm43_vm0, %v38_v7 }
  0x2e   :  { %p202_p6 = pnand %p201_p5, %p195_p2 }
 0x100   :  { %v113_v8 = vpop.f32.mrb[0].mxu0 }
 0x101   :  { %v115_v9 = vpop.f32.mrb[1].mxu0 }
 0x102   :  { %v120_v10 = vcombine.low %v113_v8, %v115_v9 }
 0x104   :  { %122 = vst [vmem:[#allocation7] sm:$0xff] %v120_v10 }
 0x105   :  { %205 = shalt.err (!%p202_p6)
}
 0x106   :  { %s206_s10 = scalar_lea.hbm %s288_s2, 128 }
 0x107   :  { %p207_p7 = scmp.ne.s32.totalorder %s288_s2, %s206_s10  ;;  %p210_p8 = scmp.lt.u32.totalorder %s206_s10, %s288_s2 }
 0x109   :  { %p212_p9 = pnand %p210_p8, %p207_p7 }
 0x10b   :  { %215 = shalt.err (!%p212_p9)
}
 0x10c   :  { %132 = dma.vmem_to_hbm [thread:$0]  %s130_s7, 128, %s288_s2, [#allocation4]  }
 0x10d   :  { %220 = dma.done.wait [#allocation4], 128  }
 0x10e   :  { %221 = vsyncadd [#allocation4], 4294967168 }
 0x10f   :  { %136 = vsyncpa [#allocation3], 1 }
 0x110   :  { %137 = vsyncpa [#allocation6], 1 }
 0x111   :  { %138 = vsyncpa [#allocation4], 1 }

</bundles_post_ra>
